<compile_context>
chip_gen: v6e
topology: v6e:2x2x1
jax: 0.10.0
libtpu: 0.0.40
codegen_flags: <defaults>
</compile_context>

<pallas_src>
import functools

import jax
import jax.numpy as jnp
from jax.experimental import pallas as pl
from jax.experimental.pallas import tpu as pltpu


def _round_up(x, m):
    return (x + m - 1) // m * m


def _pad2(x, rows, cols):
    r, c = x.shape
    if r == rows and c == cols:
        return x
    return jnp.pad(x, ((0, rows - r), (0, cols - c)))


def _mag_kernel(t_ref, v_ref, a_ref,
                wv_ref, wa_ref, wt_ref, bias_ref,
                out_ref,
                *, dt, beta_shift, eps, ln_eps):
    t = t_ref[...]
    v = v_ref[...]
    a = a_ref[...]

    # Fused same-LHS matmuls (each output is 2*Dt lanes wide):
    #   v_proj = v @ [W_hv_v | W_v]
    #   a_proj = a @ [W_ha_a | W_a]
    #   t_proj = t @ [W_hv_t | W_ha_t]
    # Operands keep their input dtype (bf16-friendly); accumulate in f32.
    v_proj = jnp.dot(v, wv_ref[...], preferred_element_type=jnp.float32)
    a_proj = jnp.dot(a, wa_ref[...], preferred_element_type=jnp.float32)
    t_proj = jnp.dot(t, wt_ref[...], preferred_element_type=jnp.float32)

    b_hv = bias_ref[0:1, :]
    b_ha = bias_ref[1:2, :]
    b_v = bias_ref[2:3, :]
    b_a = bias_ref[3:4, :]
    gamma = bias_ref[4:5, :]
    beta = bias_ref[5:6, :]

    # weight_v = relu(W_hv(cat(visual, text))), weight_a = relu(W_ha(cat(acoustic, text)))
    weight_v = jax.nn.relu(v_proj[:, :dt] + t_proj[:, :dt] + b_hv)
    weight_a = jax.nn.relu(a_proj[:, :dt] + t_proj[:, dt:] + b_ha)
    h_v = v_proj[:, dt:] + b_v
    h_a = a_proj[:, dt:] + b_a
    h_m = weight_v * h_v + weight_a * h_a

    # L2 norms over the feature axis (f32 epilogue).
    t32 = t.astype(jnp.float32)
    em_norm = jnp.sqrt(jnp.sum(t32 * t32, axis=-1, keepdims=True))
    hm_norm = jnp.sqrt(jnp.sum(h_m * h_m, axis=-1, keepdims=True))
    hm_norm = jnp.where(hm_norm == 0.0, 1.0, hm_norm)

    # alpha = min(beta_shift * em_norm / (hm_norm + eps), 1); division routed
    # through the EUP reciprocal, plus one Newton step to recover f32 accuracy.
    denom = hm_norm + eps
    inv = pl.reciprocal(denom, approx=True)
    inv = inv * (2.0 - denom * inv)
    alpha = jnp.minimum(em_norm * inv * beta_shift, 1.0)

    emb = alpha * h_m + t32

    # LayerNorm over the feature axis (PyTorch default eps=1e-5).
    mean = jnp.mean(emb, axis=-1, keepdims=True)
    ctr = emb - mean
    var = jnp.mean(ctr * ctr, axis=-1, keepdims=True)
    out = ctr * jax.lax.rsqrt(var + ln_eps) * gamma + beta

    out_ref[...] = out.astype(out_ref.dtype)


def prepare_mag_params(params, Dv, Da, Dt, dtype=jnp.float32):
    """One-time weight prep: split/transpose/fuse the PyTorch-layout weights.

    PyTorch nn.Linear weight is (out, in); y = x @ W^T + b.  Concat-weights are
    split by input columns, transposed to (in, out), and weights that share an
    LHS are concatenated along the output dim.  Ragged input dims are padded to
    multiples of 8 with zero rows.
    """
    W_hv, b_hv = params["W_hv"]          # (Dt, Dv+Dt), (Dt,)
    W_ha, b_ha = params["W_ha"]          # (Dt, Da+Dt), (Dt,)
    W_v, b_v = params["W_v"]             # (Dt, Dv), (Dt,)
    W_a, b_a = params["W_a"]             # (Dt, Da), (Dt,)
    gamma, beta = params["ln"]           # (Dt,), (Dt,)

    Dvp = _round_up(Dv, 8)
    Dap = _round_up(Da, 8)

    wv_cat = jnp.concatenate([W_hv[:, :Dv].T, W_v.T], axis=1).astype(dtype)   # (Dv, 2*Dt)
    wa_cat = jnp.concatenate([W_ha[:, :Da].T, W_a.T], axis=1).astype(dtype)   # (Da, 2*Dt)
    wt_cat = jnp.concatenate([W_hv[:, Dv:].T, W_ha[:, Da:].T], axis=1).astype(dtype)  # (Dt, 2*Dt)

    wv_cat = _pad2(wv_cat, Dvp, 2 * Dt)
    wa_cat = _pad2(wa_cat, Dap, 2 * Dt)

    # One (8, Dt) f32 slab: b_hv, b_ha, b_v, b_a, gamma, beta, (2 zero rows).
    bias = jnp.zeros((8, Dt), jnp.float32)
    bias = (bias.at[0].set(b_hv).at[1].set(b_ha).at[2].set(b_v)
                .at[3].set(b_a).at[4].set(gamma).at[5].set(beta))

    return {"wv": wv_cat, "wa": wa_cat, "wt": wt_cat, "bias": bias}


def _choose_block_rows(n, block_rows):
    block_rows = max(8, _round_up(block_rows, 8))
    if n >= 2 * block_rows:
        return block_rows
    # Small problem: aim for ~2 tiles so both TensorCores (v7x) get work.
    return max(8, _round_up(-(-n // 2), 8))


def mag_forward(text, visual, acoustic, prep, *, beta_shift=1.0,
                eps=1e-6, ln_eps=1e-5, block_rows=256):
    """text:(B,S,Dt) visual:(B,S,Dv) acoustic:(B,S,Da) -> (B,S,Dt)."""
    B, S, Dt = text.shape
    Dv = visual.shape[-1]
    Da = acoustic.shape[-1]
    Dvp = prep["wv"].shape[0]
    Dap = prep["wa"].shape[0]
    N = B * S

    bm = _choose_block_rows(N, block_rows)
    Npad = _round_up(N, bm)
    grid = (Npad // bm,)

    # Pad rows up to Npad (padded rows are independent and sliced away) and
    # ragged feature dims up to the weight-row padding.
    t2 = _pad2(text.reshape(N, Dt), Npad, Dt)
    v2 = _pad2(visual.reshape(N, Dv), Npad, Dvp)
    a2 = _pad2(acoustic.reshape(N, Da), Npad, Dap)

    kernel = functools.partial(_mag_kernel, dt=Dt,
                               beta_shift=float(beta_shift),
                               eps=float(eps), ln_eps=float(ln_eps))

    row_spec = lambda d: pl.BlockSpec((bm, d), lambda i: (i, 0))
    const_spec = lambda r, c: pl.BlockSpec((r, c), lambda i: (0, 0))

    # TODO(synk): for deployments with Dt < 128 that are store-bound on v5e,
    # repack the output into a 128-lane-dense slab; for MAG-BERT (Dt=768) the
    # output is already lane-dense.
    out2 = pl.pallas_call(
        kernel,
        out_shape=jax.ShapeDtypeStruct((Npad, Dt), text.dtype),
        grid_spec=pltpu.PrefetchScalarGridSpec(
            num_scalar_prefetch=0,
            grid=grid,
            in_specs=[
                row_spec(Dt),              # text rows
                row_spec(Dvp),             # visual rows (feature-padded)
                row_spec(Dap),             # acoustic rows (feature-padded)
                const_spec(Dvp, 2 * Dt),   # [W_hv_v | W_v]
                const_spec(Dap, 2 * Dt),   # [W_ha_a | W_a]
                const_spec(Dt, 2 * Dt),    # [W_hv_t | W_ha_t]
                const_spec(8, Dt),         # bias / LayerNorm slab
            ],
            out_specs=pl.BlockSpec((bm, Dt), lambda i: (i, 0)),
        ),
        compiler_params=pltpu.CompilerParams(
            dimension_semantics=("parallel",)),
    )(t2, v2, a2, prep["wv"], prep["wa"], prep["wt"], prep["bias"])

    return out2[:N].reshape(B, S, Dt)


def _reference(text, visual, acoustic, params, beta_shift, eps=1e-6, ln_eps=1e-5):
    W_hv, b_hv = params["W_hv"]
    W_ha, b_ha = params["W_ha"]
    W_v, b_v = params["W_v"]
    W_a, b_a = params["W_a"]
    gamma, beta = params["ln"]
    weight_v = jax.nn.relu(jnp.concatenate([visual, text], -1) @ W_hv.T + b_hv)
    weight_a = jax.nn.relu(jnp.concatenate([acoustic, text], -1) @ W_ha.T + b_ha)
    h_m = weight_v * (visual @ W_v.T + b_v) + weight_a * (acoustic @ W_a.T + b_a)
    em_norm = jnp.linalg.norm(text, axis=-1)
    hm_norm = jnp.linalg.norm(h_m, axis=-1)
    hm_norm = jnp.where(hm_norm == 0, jnp.ones_like(hm_norm), hm_norm)
    alpha = jnp.minimum(em_norm / (hm_norm + eps) * beta_shift, 1.0)[..., None]
    emb = alpha * h_m + text
    mean = emb.mean(-1, keepdims=True)
    var = ((emb - mean) ** 2).mean(-1, keepdims=True)
    return ((emb - mean) * jax.lax.rsqrt(var + ln_eps)) * gamma + beta


if __name__ == "__main__":
    # Small shapes consistent with the module: batch=2, seq=8,
    # text_feat_dim=32, video_feat_dim=16, audio_feat_dim=16.
    B, S, Dt, Dv, Da = 2, 8, 32, 16, 16
    beta_shift = 0.5

    key = jax.random.PRNGKey(0)
    ks = jax.random.split(key, 12)

    text = jax.random.normal(ks[0], (B, S, Dt), jnp.float32)
    visual = jax.random.normal(ks[1], (B, S, Dv), jnp.float32)
    acoustic = jax.random.normal(ks[2], (B, S, Da), jnp.float32)

    def lin(kw, kb, out_dim, in_dim):
        bound = 1.0 / (in_dim ** 0.5)
        W = jax.random.uniform(kw, (out_dim, in_dim), jnp.float32, -bound, bound)
        b = jax.random.uniform(kb, (out_dim,), jnp.float32, -bound, bound)
        return W, b

    params = {
        "W_hv": lin(ks[3], ks[4], Dt, Dv + Dt),
        "W_ha": lin(ks[5], ks[6], Dt, Da + Dt),
        "W_v": lin(ks[7], ks[8], Dt, Dv),
        "W_a": lin(ks[9], ks[10], Dt, Da),
        "ln": (jnp.ones((Dt,), jnp.float32), jnp.zeros((Dt,), jnp.float32)),
    }

    # Weight transposes / fusion hoisted out of the hot path (done once).
    prep = prepare_mag_params(params, Dv, Da, Dt, dtype=text.dtype)

    fwd = jax.jit(functools.partial(mag_forward, beta_shift=beta_shift))
    out = jax.block_until_ready(fwd(text, visual, acoustic, prep))

    ref = _reference(text, visual, acoustic, params, beta_shift)
    assert out.shape == (B, S, Dt)
    assert jnp.allclose(out, ref, atol=5e-4, rtol=5e-4)
    print("KERNEL_OK")
</pallas_src>

<mosaic_0001>
module attributes {stable_mosaic.version = 11 : i64} {
  func.func @_mag_kernel(%arg0: i32, %arg1: memref<8x32xf32, #tpu.memory_space<vmem>>, %arg2: memref<8x16xf32, #tpu.memory_space<vmem>>, %arg3: memref<8x16xf32, #tpu.memory_space<vmem>>, %arg4: memref<16x64xf32, #tpu.memory_space<vmem>>, %arg5: memref<16x64xf32, #tpu.memory_space<vmem>>, %arg6: memref<32x64xf32, #tpu.memory_space<vmem>>, %arg7: memref<8x32xf32, #tpu.memory_space<vmem>>, %arg8: memref<8x32xf32, #tpu.memory_space<vmem>>) attributes {dimension_semantics = [#tpu.dimension_semantics<parallel>], iteration_bounds = array<i64: 2>, scalar_prefetch = 0 : i64, scratch_operands = 0 : i64, tpu.core_type = #tpu.core_type<tc>, window_params = [{transform_indices = @transform_0, window_bounds = array<i64: 8, 32>}, {transform_indices = @transform_1, window_bounds = array<i64: 8, 16>}, {transform_indices = @transform_2, window_bounds = array<i64: 8, 16>}, {pipeline_mode = #tpu.pipeline_mode<synchronous>, transform_indices = @transform_3, window_bounds = array<i64: 16, 64>}, {pipeline_mode = #tpu.pipeline_mode<synchronous>, transform_indices = @transform_4, window_bounds = array<i64: 16, 64>}, {pipeline_mode = #tpu.pipeline_mode<synchronous>, transform_indices = @transform_5, window_bounds = array<i64: 32, 64>}, {pipeline_mode = #tpu.pipeline_mode<synchronous>, transform_indices = @transform_6, window_bounds = array<i64: 8, 32>}, {transform_indices = @transform_7, window_bounds = array<i64: 8, 32>}]} {
    %c0 = arith.constant 0 : index
    %c0_0 = arith.constant 0 : index
    %0 = vector.load %arg1[%c0, %c0_0] : memref<8x32xf32, #tpu.memory_space<vmem>>, vector<8x32xf32>
    %c0_1 = arith.constant 0 : index
    %c0_2 = arith.constant 0 : index
    %1 = vector.load %arg2[%c0_1, %c0_2] : memref<8x16xf32, #tpu.memory_space<vmem>>, vector<8x16xf32>
    %c0_3 = arith.constant 0 : index
    %c0_4 = arith.constant 0 : index
    %2 = vector.load %arg3[%c0_3, %c0_4] : memref<8x16xf32, #tpu.memory_space<vmem>>, vector<8x16xf32>
    %c0_5 = arith.constant 0 : index
    %c0_6 = arith.constant 0 : index
    %3 = vector.load %arg4[%c0_5, %c0_6] : memref<16x64xf32, #tpu.memory_space<vmem>>, vector<16x64xf32>
    %cst = arith.constant dense<0.000000e+00> : vector<8x64xf32>
    %4 = tpu.matmul %1, %3, %cst {dimension_numbers = #tpu.dot_dimension_numbers<[1], [0], [0], [1], [0, 0, 1, 1], [], []>} : vector<8x16xf32>, vector<16x64xf32>, vector<8x64xf32> -> vector<8x64xf32>
    %c0_7 = arith.constant 0 : index
    %c0_8 = arith.constant 0 : index
    %5 = vector.load %arg5[%c0_7, %c0_8] : memref<16x64xf32, #tpu.memory_space<vmem>>, vector<16x64xf32>
    %cst_9 = arith.constant dense<0.000000e+00> : vector<8x64xf32>
    %6 = tpu.matmul %2, %5, %cst_9 {dimension_numbers = #tpu.dot_dimension_numbers<[1], [0], [0], [1], [0, 0, 1, 1], [], []>} : vector<8x16xf32>, vector<16x64xf32>, vector<8x64xf32> -> vector<8x64xf32>
    %c0_10 = arith.constant 0 : index
    %c0_11 = arith.constant 0 : index
    %7 = vector.load %arg6[%c0_10, %c0_11] : memref<32x64xf32, #tpu.memory_space<vmem>>, vector<32x64xf32>
    %cst_12 = arith.constant dense<0.000000e+00> : vector<8x64xf32>
    %8 = tpu.matmul %0, %7, %cst_12 {dimension_numbers = #tpu.dot_dimension_numbers<[1], [0], [0], [1], [0, 0, 1, 1], [], []>} : vector<8x32xf32>, vector<32x64xf32>, vector<8x64xf32> -> vector<8x64xf32>
    %c0_13 = arith.constant 0 : index
    %c0_14 = arith.constant 0 : index
    %9 = vector.load %arg7[%c0_13, %c0_14] : memref<8x32xf32, #tpu.memory_space<vmem>>, vector<1x32xf32>
    %c1 = arith.constant 1 : index
    %c0_15 = arith.constant 0 : index
    %10 = vector.load %arg7[%c1, %c0_15] : memref<8x32xf32, #tpu.memory_space<vmem>>, vector<1x32xf32>
    %c2 = arith.constant 2 : index
    %c0_16 = arith.constant 0 : index
    %11 = vector.load %arg7[%c2, %c0_16] : memref<8x32xf32, #tpu.memory_space<vmem>>, vector<1x32xf32>
    %c3 = arith.constant 3 : index
    %c0_17 = arith.constant 0 : index
    %12 = vector.load %arg7[%c3, %c0_17] : memref<8x32xf32, #tpu.memory_space<vmem>>, vector<1x32xf32>
    %c4 = arith.constant 4 : index
    %c0_18 = arith.constant 0 : index
    %13 = vector.load %arg7[%c4, %c0_18] : memref<8x32xf32, #tpu.memory_space<vmem>>, vector<1x32xf32>
    %c5 = arith.constant 5 : index
    %c0_19 = arith.constant 0 : index
    %14 = vector.load %arg7[%c5, %c0_19] : memref<8x32xf32, #tpu.memory_space<vmem>>, vector<1x32xf32>
    %15 = vector.extract_strided_slice %4 {offsets = [0, 0], sizes = [8, 32], strides = [1, 1]} : vector<8x64xf32> to vector<8x32xf32>
    %16 = vector.extract_strided_slice %8 {offsets = [0, 0], sizes = [8, 32], strides = [1, 1]} : vector<8x64xf32> to vector<8x32xf32>
    %17 = arith.addf %15, %16 : vector<8x32xf32>
    %18 = vector.broadcast %9 : vector<1x32xf32> to vector<8x32xf32>
    %19 = arith.addf %17, %18 : vector<8x32xf32>
    %cst_20 = arith.constant 0.000000e+00 : f32
    %20 = vector.broadcast %cst_20 : f32 to vector<8x32xf32>
    %21 = arith.maximumf %19, %20 : vector<8x32xf32>
    %22 = vector.extract_strided_slice %6 {offsets = [0, 0], sizes = [8, 32], strides = [1, 1]} : vector<8x64xf32> to vector<8x32xf32>
    %23 = vector.extract_strided_slice %8 {offsets = [0, 32], sizes = [8, 32], strides = [1, 1]} : vector<8x64xf32> to vector<8x32xf32>
    %24 = arith.addf %22, %23 : vector<8x32xf32>
    %25 = vector.broadcast %10 : vector<1x32xf32> to vector<8x32xf32>
    %26 = arith.addf %24, %25 : vector<8x32xf32>
    %cst_21 = arith.constant 0.000000e+00 : f32
    %27 = vector.broadcast %cst_21 : f32 to vector<8x32xf32>
    %28 = arith.maximumf %26, %27 : vector<8x32xf32>
    %29 = vector.extract_strided_slice %4 {offsets = [0, 32], sizes = [8, 32], strides = [1, 1]} : vector<8x64xf32> to vector<8x32xf32>
    %30 = vector.broadcast %11 : vector<1x32xf32> to vector<8x32xf32>
    %31 = arith.addf %29, %30 : vector<8x32xf32>
    %32 = vector.extract_strided_slice %6 {offsets = [0, 32], sizes = [8, 32], strides = [1, 1]} : vector<8x64xf32> to vector<8x32xf32>
    %33 = vector.broadcast %12 : vector<1x32xf32> to vector<8x32xf32>
    %34 = arith.addf %32, %33 : vector<8x32xf32>
    %35 = arith.mulf %21, %31 : vector<8x32xf32>
    %36 = arith.mulf %28, %34 : vector<8x32xf32>
    %37 = arith.addf %35, %36 : vector<8x32xf32>
    %38 = arith.mulf %0, %0 : vector<8x32xf32>
    %cst_22 = arith.constant dense<0.000000e+00> : vector<8xf32>
    %39 = vector.multi_reduction <add>, %38, %cst_22 [1] : vector<8x32xf32> to vector<8xf32>
    %40 = vector.shape_cast %39 : vector<8xf32> to vector<8x1xf32>
    %41 = math.sqrt %40 : vector<8x1xf32>
    %42 = arith.mulf %37, %37 : vector<8x32xf32>
    %cst_23 = arith.constant dense<0.000000e+00> : vector<8xf32>
    %43 = vector.multi_reduction <add>, %42, %cst_23 [1] : vector<8x32xf32> to vector<8xf32>
    %44 = vector.shape_cast %43 : vector<8xf32> to vector<8x1xf32>
    %45 = math.sqrt %44 : vector<8x1xf32>
    %cst_24 = arith.constant 0.000000e+00 : f32
    %46 = vector.broadcast %cst_24 : f32 to vector<8x1xf32>
    %47 = arith.cmpf oeq, %45, %46 : vector<8x1xf32>
    %cst_25 = arith.constant 1.000000e+00 : f32
    %48 = vector.broadcast %cst_25 : f32 to vector<8x1xf32>
    %49 = arith.select %47, %48, %45 : vector<8x1xi1>, vector<8x1xf32>
    %cst_26 = arith.constant 9.99999997E-7 : f32
    %50 = vector.broadcast %cst_26 : f32 to vector<8x1xf32>
    %51 = arith.addf %49, %50 : vector<8x1xf32>
    %52 = tpu.reciprocal %51 {approx = true} : vector<8x1xf32> -> vector<8x1xf32>
    %53 = arith.mulf %51, %52 : vector<8x1xf32>
    %cst_27 = arith.constant 2.000000e+00 : f32
    %54 = vector.broadcast %cst_27 : f32 to vector<8x1xf32>
    %55 = arith.subf %54, %53 : vector<8x1xf32>
    %56 = arith.mulf %52, %55 : vector<8x1xf32>
    %57 = arith.mulf %41, %56 : vector<8x1xf32>
    %cst_28 = arith.constant 5.000000e-01 : f32
    %58 = vector.broadcast %cst_28 : f32 to vector<8x1xf32>
    %59 = arith.mulf %57, %58 : vector<8x1xf32>
    %cst_29 = arith.constant 1.000000e+00 : f32
    %60 = vector.broadcast %cst_29 : f32 to vector<8x1xf32>
    %61 = arith.minimumf %59, %60 : vector<8x1xf32>
    %62 = vector.broadcast %61 : vector<8x1xf32> to vector<8x32xf32>
    %63 = arith.mulf %62, %37 : vector<8x32xf32>
    %64 = arith.addf %63, %0 : vector<8x32xf32>
    %cst_30 = arith.constant dense<0.000000e+00> : vector<8xf32>
    %65 = vector.multi_reduction <add>, %64, %cst_30 [1] : vector<8x32xf32> to vector<8xf32>
    %66 = vector.shape_cast %65 : vector<8xf32> to vector<8x1xf32>
    %cst_31 = arith.constant 3.200000e+01 : f32
    %67 = vector.broadcast %cst_31 : f32 to vector<8x1xf32>
    %68 = arith.divf %66, %67 : vector<8x1xf32>
    %69 = vector.broadcast %68 : vector<8x1xf32> to vector<8x32xf32>
    %70 = arith.subf %64, %69 : vector<8x32xf32>
    %71 = arith.mulf %70, %70 : vector<8x32xf32>
    %cst_32 = arith.constant dense<0.000000e+00> : vector<8xf32>
    %72 = vector.multi_reduction <add>, %71, %cst_32 [1] : vector<8x32xf32> to vector<8xf32>
    %73 = vector.shape_cast %72 : vector<8xf32> to vector<8x1xf32>
    %cst_33 = arith.constant 3.200000e+01 : f32
    %74 = vector.broadcast %cst_33 : f32 to vector<8x1xf32>
    %75 = arith.divf %73, %74 : vector<8x1xf32>
    %cst_34 = arith.constant 9.99999974E-6 : f32
    %76 = vector.broadcast %cst_34 : f32 to vector<8x1xf32>
    %77 = arith.addf %75, %76 : vector<8x1xf32>
    %78 = math.rsqrt %77 : vector<8x1xf32>
    %79 = vector.broadcast %78 : vector<8x1xf32> to vector<8x32xf32>
    %80 = arith.mulf %70, %79 : vector<8x32xf32>
    %81 = vector.broadcast %13 : vector<1x32xf32> to vector<8x32xf32>
    %82 = arith.mulf %80, %81 : vector<8x32xf32>
    %83 = vector.broadcast %14 : vector<1x32xf32> to vector<8x32xf32>
    %84 = arith.addf %82, %83 : vector<8x32xf32>
    %c0_35 = arith.constant 0 : index
    %c0_36 = arith.constant 0 : index
    %85 = vector.load %arg8[%c0_35, %c0_36] : memref<8x32xf32, #tpu.memory_space<vmem>>, vector<8x32xf32>
    tpu.vector_store %arg8[%c0_35, %c0_36], %84 {strides = array<i32>} : memref<8x32xf32, #tpu.memory_space<vmem>>, vector<8x32xf32>,
    return
  }
  func.func @transform_0(%arg0: i32) -> (i32, i32) {
    %c0_i32 = arith.constant 0 : i32
    %c0_i32_0 = arith.constant 0 : i32
    return %arg0, %c0_i32 : i32, i32
  }
  func.func @transform_1(%arg0: i32) -> (i32, i32) {
    %c0_i32 = arith.constant 0 : i32
    %c0_i32_0 = arith.constant 0 : i32
    return %arg0, %c0_i32 : i32, i32
  }
  func.func @transform_2(%arg0: i32) -> (i32, i32) {
    %c0_i32 = arith.constant 0 : i32
    %c0_i32_0 = arith.constant 0 : i32
    return %arg0, %c0_i32 : i32, i32
  }
  func.func @transform_3(%arg0: i32) -> (i32, i32) {
    %c0_i32 = arith.constant 0 : i32
    %c0_i32_0 = arith.constant 0 : i32
    %c0_i32_1 = arith.constant 0 : i32
    return %c0_i32, %c0_i32_0 : i32, i32
  }
  func.func @transform_4(%arg0: i32) -> (i32, i32) {
    %c0_i32 = arith.constant 0 : i32
    %c0_i32_0 = arith.constant 0 : i32
    %c0_i32_1 = arith.constant 0 : i32
    return %c0_i32, %c0_i32_0 : i32, i32
  }
  func.func @transform_5(%arg0: i32) -> (i32, i32) {
    %c0_i32 = arith.constant 0 : i32
    %c0_i32_0 = arith.constant 0 : i32
    %c0_i32_1 = arith.constant 0 : i32
    return %c0_i32, %c0_i32_0 : i32, i32
  }
  func.func @transform_6(%arg0: i32) -> (i32, i32) {
    %c0_i32 = arith.constant 0 : i32
    %c0_i32_0 = arith.constant 0 : i32
    %c0_i32_1 = arith.constant 0 : i32
    return %c0_i32, %c0_i32_0 : i32, i32
  }
  func.func @transform_7(%arg0: i32) -> (i32, i32) {
    %c0_i32 = arith.constant 0 : i32
    %c0_i32_0 = arith.constant 0 : i32
    return %arg0, %c0_i32 : i32, i32
  }
}

</mosaic_0001>

<bundles_post_ra>
// kernel: mag_forward.1
= control target key start
LH: loop header
LB: loop body
LE: loop exit
PB: predicated region body
PF: predicated region fallthrough
CT: control target
= control target key end

     0   :  { %s1660_s0 = inlined_call_operand.hbm [shape: f32[16,32], index: 0, kind: input, shape index: {}]   ;;  %s1661_s1 = inlined_call_operand.hbm [shape: f32[16,16], index: 1, kind: input, shape index: {}]   ;;  %s1662_s2 = inlined_call_operand.hbm [shape: f32[16,16], index: 2, kind: input, shape index: {}]   ;;  %s1663_s3 = inlined_call_operand.vmem [shape: f32[16,64], index: 3, kind: input, shape index: {}]   ;;  %s1664_s4 = inlined_call_operand.hbm [shape: f32[16,64], index: 4, kind: input, shape index: {}]   ;;  %s1665_s5 = inlined_call_operand.hbm [shape: f32[32,64], index: 5, kind: input, shape index: {}]   ;;  %s1666_s6 = inlined_call_operand.hbm [shape: f32[8,32], index: 6, kind: input, shape index: {}]   ;;  %s1667_s7 = inlined_call_operand.hbm [shape: f32[16,32], index: 7, kind: output, shape index: {}]  }
   0x1   :  { %1683 = sst [smem:[#allocation24_spill]] %s1661_s1 }
   0x2   :  { %1684 = sst [smem:[#allocation25_spill]] %s1664_s4 }
   0x3   :  { %12 = vsyncpa [#allocation3], 0 }
   0x4   :  { %14 = vsyncpa [#allocation3 + $0x1], 0 }
   0x5   :  { %15 = vsyncpa [#allocation6], 0 }
   0x6   :  { %17 = vsyncpa [#allocation6 + $0x1], 0 }
   0x7   :  { %18 = vsyncpa [#allocation9], 0 }
   0x8   :  { %19 = vsyncpa [#allocation12], 0 }
   0x9   :  { %20 = vsyncpa [#allocation4], 0 }
   0xa   :  { %22 = vsyncpa [#allocation4 + $0x1], 0  ;;  %s1370_s24 = smov 0   ;;  %s1372_s25 = smov 0  }
   0xb   :  { %s1374_s26 = smov 0   ;;  %s1376_s27 = smov 0  }
   0xc LB: > { %1685 = sst [smem:[#allocation19_spill]] %s1303_s24  ;;  %s1391_s28 = sadd.s32 4294967295, %s1315_s27   ;;  %s1315_s27 = sphi %s1376_s27, %s1717_s27   ;;  %s1311_s26 = sphi %s1374_s26, %s1721_s26   ;;  %s1307_s25 = sphi %s1372_s25, %s1720_s25   ;;  %s1303_s24 = sphi %s1370_s24, %s1719_s24  }
   0xd   : > { %1686 = sst [smem:[#allocation20_spill]] %s1315_s27  ;;  %s907_s29 = sadd.s32 4294967294, %s1315_s27  }
   0xe   : > { %p48_p0 = scmp.ne.s32.totalorder %s1307_s25, %s1303_s24  ;;  %p1673_p1 = scmp.eq.s32.totalorder %s1391_s28, 0 }
   0xf   : > { %p208_p2 = scmp.eq.s32.totalorder %s1391_s28, 1  ;;  %p214_p3 = scmp.eq.s32.totalorder %s907_s29, 1 }
  0x10   : > { %p1400_p4 = por %p1673_p1, %p48_p0  ;;  %p908_p5 = scmp.ge.s32.totalorder %s1315_s27, 1 }
  0x11   : > { %p1405_p6 = por %p214_p3, %p48_p0  ;;  %p221_p7 = scmp.lt.s32.totalorder %s1315_s27, 3 }
  0x12   : > { %s1687_s30 = scalar_select %p1400_p4, 1, 0 }
  0x13   : > { %s1688_s8 = scalar_select %p1405_p6, 1, 0 }
  0x14   : > { %p1410_p8 = pnand %p908_p5, %p221_p7  ;;  %s1317_s10 = smov [#allocation8]  }
  0x15   : > { %1689 = sst [smem:[#allocation21_spill]] %s1688_s8  ;;  %s236_s11 = sshll.u32 %s1317_s10, 4  ;;  %s237_s11 = int_to_ptr.vmem [resolvable:$true] %s236_s11 }
  0x16   : > { %s1690_s9 = scalar_select %p1410_p8, 1, 0 }
  0x17   : > { %p996_p9 = pneg %p1410_p8  ;;  %s1424_s13 = sadd.s32 1, %s1315_s27  }
  0x18   : > { %1692 = sst [smem:[#allocation22_spill]] %s1424_s13  ;;  %s35_s14 = sadd.s32 1, %s1311_s26 }
  0x19   : > { %p1419_p11 = pnand %p996_p9, %p1673_p1  ;;  %s32_s15 = ssub.s32 %s1315_s27, %s1424_s13 }
  0x1a   : > { %s1088_s16 = scalar_lea.vmem %s237_s11, 256  ;;  %p1096_p5 = scmp.lt.s32.totalorder %s237_s11, %s237_s11 }
  0x1b   : > { %s1691_s12 = scalar_select %p1419_p11, 1, 0 }
  0x1c   : > { %p1674_p12 = pneg %p1419_p11  ;;  %p1089_p13 = scmp.ne.s32.totalorder %s237_s11, %s1088_s16 }
  0x1d   : > { %p1097_p7 = scmp.lt.s32.totalorder %s1088_s16, %s1088_s16 }
  0x1e   : > { %p1091_p0 = pnand %p1089_p13, %p1674_p12 }
  0x1f   : > { %p1098_p9 = por %p1097_p7, %p1096_p5 }
  0x20   : > { %p1092_p3 = pneg %p1091_p0 }
  0x22   : > { %p1099_p10 = pnand %p1098_p9, %p1092_p3 }
  0x24   : > { %1102 = shalt.err (!%p1099_p10)
}
  0x25   : > { %s1668_s17 = smov 128   ;;  %s1670_s18 = smov 8  }
  0x26   : > { %s1693_s4 = sld [smem:[#allocation25_spill]]  ;;  %p33_p10 = scmp.eq.s32.totalorder %s32_s15, 0 }
  0x27   : > { %p42_p13 = scmp.ne.s32.totalorder %s1311_s26, %s1307_s25  ;;  %p43_p0 = scmp.eq.s32.totalorder %s1315_s27, 0 }
  0x28   : > { %p1023_p3 = scmp.lt.s32.totalorder %s1315_s27, 2  ;;  %s1669_s23 = sand.u32 1, %s1311_s26  }
  0x29   : > { %s1447_s21 = scalar_select %p33_p10, %s1311_s26, %s35_s14  }
  0x2a   : > { %p44_p5 = por %p43_p0, %p42_p13  ;;  %p1451_p7 = por %p208_p2, %p42_p13 }
  0x2b   : > { %1694 = sst [smem:[#allocation23_spill]] %s1447_s21  ;;  %s1457_s29 = sshll.u32 %s1315_s27, 7 }
  0x2c   : > { %999 = dma.hbm_to_vmem [thread:$0]  (!%p1419_p11), %s1693_s4, 256, %s237_s11, [#allocation9], %s1668_s17, %s1668_s17, %s1670_s18  }
  0x2d   : > { %s1695_s22 = scalar_select %p1451_p7, 1, 0 }
  0x2e   : > { %s1461_s10 = sshll.u32 %s1669_s23, 3  ;;  %p1463_p9 = pnand %p1023_p3, %p44_p5 }
  0x2f   : > { %s292_s14 = sand.u32 1, %s1315_s27   ;;  %s1697_s1 = sld [smem:[#allocation24_spill]] }
  0x30   : > { %s296_s20 = scalar_lea.vmem [#allocation5], %s1461_s10  ;;  %s1475_s23 = scalar_lea.sflag [#allocation6], %s292_s14 }
  0x31   : > { %s303_s17 = sshll.u32 %s296_s20, 4  ;;  %p1481_p10 = pneg %p1463_p9  ;;  %s304_s17 = int_to_ptr.vmem [resolvable:$true] %s303_s17 }
  0x35   : > { %s1472_s19 = scalar_lea.hbm %s1697_s1, %s1457_s29  ;;  %s1108_s21 = scalar_lea.hbm %s1697_s1, 256 }
  0x36   : > { %s1103_s18 = scalar_lea.hbm %s1472_s19, 128  ;;  %p1109_p3 = scmp.lt.s32.totalorder %s1472_s19, %s1697_s1 }
  0x37   : > { %p1104_p2 = scmp.ne.s32.totalorder %s1472_s19, %s1103_s18  ;;  %p1110_p5 = scmp.lt.s32.totalorder %s1108_s21, %s1103_s18 }
  0x39   : > { %p1106_p13 = pnand %p1481_p10, %p1104_p2  ;;  %p1111_p1 = por %p1110_p5, %p1109_p3 }
  0x3b   : > { %p1107_p0 = pneg %p1106_p13 }
  0x3d   : > { %p1112_p12 = pnand %p1111_p1, %p1107_p0 }
  0x3f   : > { %1115 = shalt.err (!%p1112_p12)
}
  0x40   : > { %s1116_s14 = scalar_lea.vmem %s304_s17, 128  ;;  %s1320_s27 = smov [#allocation5]  }
  0x41   : > { %p1117_p6 = scmp.ne.s32.totalorder %s304_s17, %s1116_s14  ;;  %s1121_s8 = sshll.u32 %s1320_s27, 4  ;;  %s1122_s8 = int_to_ptr.vmem [resolvable:$false] %s1121_s8 }
  0x42   : > { %s1123_s24 = scalar_lea.vmem %s1122_s8, 256  ;;  %p1124_p2 = scmp.lt.s32.totalorder %s304_s17, %s1122_s8 }
  0x43   : > { %p1119_p7 = pnand %p1117_p6, %p1481_p10  ;;  %p1125_p13 = scmp.lt.s32.totalorder %s1123_s24, %s1116_s14 }
  0x45   : > { %p1120_p4 = pneg %p1119_p7  ;;  %p1126_p8 = por %p1125_p13, %p1124_p2 }
  0x47   : > { %p1127_p11 = pnand %p1126_p8, %p1120_p4 }
  0x49   : > { %1130 = shalt.err (!%p1127_p11)
}
  0x4a   : > { %1012 = dma.hbm_to_vmem [thread:$0]  (!%p1463_p9), %s1472_s19, 128, %s304_s17, %s1475_s23  }
  0x4b   : > { %s1321_s13 = smov [#allocation10]   ;;  %s1322_s21 = smov [#allocation11]  }
  0x4c   : > { %s249_s18 = sshll.u32 %s1321_s13, 4  ;;  %s263_s15 = sshll.u32 %s1322_s21, 4  ;;  %s250_s18 = int_to_ptr.vmem [resolvable:$true] %s249_s18  ;;  %s264_s15 = int_to_ptr.vmem [resolvable:$true] %s263_s15 }
  0x4d   : > { %s1142_s16 = scalar_lea.vmem %s250_s18, 512  ;;  %p1699_p6 = scmp.ne.s32.totalorder %s1691_s12, 0 }
  0x4e   : > { %p1143_p1 = scmp.ne.s32.totalorder %s250_s18, %s1142_s16  ;;  %p1150_p3 = scmp.lt.s32.totalorder %s250_s18, %s250_s18 }
  0x4f   : > { %p1700_p12 = pneg %p1699_p6  ;;  %p1151_p4 = scmp.lt.s32.totalorder %s1142_s16, %s1142_s16 }
  0x51   : > { %p1145_p7 = pnand %p1143_p1, %p1700_p12  ;;  %p1152_p8 = por %p1151_p4, %p1150_p3 }
  0x53   : > { %p1146_p0 = pneg %p1145_p7 }
  0x55   : > { %p1153_p11 = pnand %p1152_p8, %p1146_p0 }
  0x57   : > { %1156 = shalt.err (!%p1153_p11)
}
  0x58   : > { %s1701_s24 = smov 8   ;;  %s1702_s27 = smov 128  }
  0x59   : > { %1002 = dma.hbm_to_vmem [thread:$0]  (!%p1699_p6), %s1665_s5, 512, %s250_s18, [#allocation9], %s1702_s27, %s1702_s27, %s1701_s24  }
  0x5a   : > { %s1168_s19 = scalar_lea.vmem %s264_s15, 128  ;;  %p1703_p2 = pmov %p1700_p12 }
  0x5b   : > { %p1169_p5 = scmp.ne.s32.totalorder %s264_s15, %s1168_s19  ;;  %p1176_p12 = scmp.lt.s32.totalorder %s264_s15, %s264_s15 }
  0x5c   : > { %p1177_p7 = scmp.lt.s32.totalorder %s1168_s19, %s1168_s19 }
  0x5d   : > { %p1171_p13 = pnand %p1169_p5, %p1703_p2 }
  0x5e   : > { %p1178_p0 = por %p1177_p7, %p1176_p12 }
  0x5f   : > { %p1172_p1 = pneg %p1171_p13 }
  0x61   : > { %p1179_p3 = pnand %p1178_p0, %p1172_p1 }
  0x63   : > { %1182 = shalt.err (!%p1179_p3)
}
  0x64   : > { %1005 = dma.hbm_to_vmem [thread:$0]  (!%p1699_p6), %s1666_s6, 128, %s264_s15, [#allocation12]  }
  0x65   : > { %s1523_s21 = scalar_lea.hbm %s1660_s0, %s1457_s29  ;;  %s278_s16 = scalar_lea.vmem [#allocation2], %s1461_s10 }
  0x66   : > { %s285_s24 = sshll.u32 %s278_s16, 4  ;;  %s1530_s8 = scalar_lea.hbm %s1662_s2, %s1457_s29  ;;  %s286_s24 = int_to_ptr.vmem [resolvable:$true] %s285_s24 }
  0x67   : > { %s1704_s17 = sand.u32 1, %s1311_s26   ;;  %s1183_s20 = scalar_lea.hbm %s1523_s21, 128 }
  0x68   : > { %s275_s19 = scalar_lea.sflag [#allocation3], %s1704_s17  ;;  %p1184_p6 = scmp.ne.s32.totalorder %s1523_s21, %s1183_s20 }
  0x69   : > { %s1188_s13 = scalar_lea.hbm %s1660_s0, 256  ;;  %p1189_p11 = scmp.lt.s32.totalorder %s1523_s21, %s1660_s0 }
  0x6a   : > { %p1186_p4 = pnand %p1184_p6, %p1481_p10  ;;  %p1190_p5 = scmp.lt.s32.totalorder %s1188_s13, %s1183_s20 }
  0x6c   : > { %p1187_p8 = pneg %p1186_p4  ;;  %p1191_p2 = por %p1190_p5, %p1189_p11 }
  0x6e   : > { %p1192_p13 = pnand %p1191_p2, %p1187_p8 }
  0x70   : > { %1195 = shalt.err (!%p1192_p13)
}
  0x71   : > { %s1196_s29 = scalar_lea.vmem %s286_s24, 128  ;;  %s1323_s16 = smov [#allocation2]  }
  0x72   : > { %p1197_p1 = scmp.ne.s32.totalorder %s286_s24, %s1196_s29  ;;  %s1201_s12 = sshll.u32 %s1323_s16, 4  ;;  %s1202_s12 = int_to_ptr.vmem [resolvable:$false] %s1201_s12 }
  0x73   : > { %s1203_s27 = scalar_lea.vmem %s1202_s12, 256  ;;  %p1204_p0 = scmp.lt.s32.totalorder %s286_s24, %s1202_s12 }
  0x74   : > { %p1199_p12 = pnand %p1197_p1, %p1481_p10  ;;  %p1205_p3 = scmp.lt.s32.totalorder %s1203_s27, %s1196_s29 }
  0x76   : > { %p1200_p7 = pneg %p1199_p12  ;;  %p1206_p6 = por %p1205_p3, %p1204_p0 }
  0x78   : > { %p1207_p4 = pnand %p1206_p6, %p1200_p7 }
  0x7a   : > { %1210 = shalt.err (!%p1207_p4)
}
  0x7b   : > { %1009 = dma.hbm_to_vmem [thread:$0]  (!%p1463_p9), %s1523_s21, 128, %s286_s24, %s275_s19  }
  0x7c   : > { %s314_s1 = scalar_lea.vmem [#allocation7], %s1461_s10  ;;  %s1211_s20 = scalar_lea.hbm %s1530_s8, 128 }
  0x7d   : > { %s321_s17 = sshll.u32 %s314_s1, 4  ;;  %p1212_p8 = scmp.ne.s32.totalorder %s1530_s8, %s1211_s20  ;;  %s322_s17 = int_to_ptr.vmem [resolvable:$true] %s321_s17 }
  0x7e   : > { %s1216_s13 = scalar_lea.hbm %s1662_s2, 256  ;;  %p1217_p2 = scmp.lt.s32.totalorder %s1530_s8, %s1662_s2 }
  0x7f   : > { %p1214_p11 = pnand %p1212_p8, %p1481_p10  ;;  %p1218_p13 = scmp.lt.s32.totalorder %s1216_s13, %s1211_s20 }
  0x81   : > { %p1215_p5 = pneg %p1214_p11  ;;  %p1219_p1 = por %p1218_p13, %p1217_p2 }
  0x83   : > { %p1220_p12 = pnand %p1219_p1, %p1215_p5 }
  0x85   : > { %1223 = shalt.err (!%p1220_p12)
}
  0x86   : > { %s1224_s10 = scalar_lea.vmem %s322_s17, 128  ;;  %s1324_s21 = smov [#allocation7]  }
  0x87   : > { %p1225_p7 = scmp.ne.s32.totalorder %s322_s17, %s1224_s10  ;;  %s1229_s24 = sshll.u32 %s1324_s21, 4  ;;  %s1230_s24 = int_to_ptr.vmem [resolvable:$false] %s1229_s24 }
  0x88   : > { %s1231_s19 = scalar_lea.vmem %s1230_s24, 256  ;;  %p1232_p6 = scmp.lt.s32.totalorder %s322_s17, %s1230_s24 }
  0x89   : > { %p1227_p0 = pnand %p1225_p7, %p1481_p10  ;;  %p1233_p4 = scmp.lt.s32.totalorder %s1231_s19, %s1224_s10 }
  0x8b   : > { %p1228_p3 = pneg %p1227_p0  ;;  %p1234_p8 = por %p1233_p4, %p1232_p6 }
  0x8d   : > { %p1235_p11 = pnand %p1234_p8, %p1228_p3 }
  0x8f   : > { %1238 = shalt.err (!%p1235_p11)
}
  0x90   : > { %1015 = dma.hbm_to_vmem [thread:$0]  (!%p1463_p9), %s1530_s8, 128, %s322_s17, %s1475_s23  }
  0x91   : > { %p1705_p5 = scmp.ne.s32.totalorder %s1690_s9, 0 }
  0x92   : > { %s1571_s4 = sand.u32 (!%p1705_p5), 1, %s1307_s25   ;;  %p1706_p10 = scmp.ne.s32.totalorder (!%p1705_p5), %s1687_s30, 0 }
  0x93   : > { %330 = sbr.rel (%p1705_p5) target bundleno = 1005 (0x3ed), region = 48  ;;  %s1574_s16 = sshll.u32 (!%p1705_p5), %s1571_s4, 3 }
  0x94   : > { %s333_s12 = scalar_lea.sflag (!%p1705_p5), [#allocation3], %s1571_s4  ;;  %s336_s27 = scalar_lea.vmem (!%p1705_p5), [#allocation2], %s1574_s16 }
  0x98   : > { %1282 = dma.done.wait (%p1706_p10), %s333_s12, 128  }
  0x99   : > { %1284 = vsyncadd (%p1706_p10), %s333_s12, 4294967168  ;;  %s341_s9 = sand.u32 1, %s1391_s28   ;;  %s345_s11 = scalar_lea.vmem [#allocation5], %s1574_s16 }
  0x9a   : > { %s342_s23 = scalar_lea.sflag [#allocation6], %s341_s9 }
  0x9b   : > { %1286 = dma.done.wait (%p1706_p10), %s342_s23, 256  }
  0x9c   : > { %1288 = vsyncadd (%p1706_p10), %s342_s23, 4294967040  ;;  %s354_s8 = scalar_lea.vmem [#allocation7], %s1574_s16  ;;  %p1707_p9 = scmp.eq.s32.totalorder %s1391_s28, 0 }
  0x9e   : > { %1290 = dma.done.wait (%p1707_p9), [#allocation9], 768   ;;  %p1708_p2 = pmov %p1707_p9 }
  0xa0   : > { %1292 = vsyncadd (%p1708_p2), [#allocation9], 4294966528  ;;  %p1709_p13 = pmov %p1708_p2 }
  0xa1   : > { %p1710_p1 = pmov %p1708_p2 }
  0xa2   : > { %1294 = dma.done.wait (%p1709_p13), [#allocation12], 128  }
  0xa3   : > { %1296 = vsyncadd (%p1710_p1), [#allocation12], 4294967168  ;;  %v1325_v0 = vmov 0.0   ;;  %vm1326_vm0 = vmmov 0   ;;  %v564_v1 = vld [vmem:[#allocation10 + $0x18] sm:$0xff]  ;;  %v411_v2 = vld [vmem:[%s1663_s3 + $0x8] sm:$0xff] }
  0xa4   : > { %965 = vmatprep.subr.mxu0 %v1325_v0  ;;  %951 = vmatprep.subr.mxu1 %v1325_v0  ;;  %v563_v3 = vld [vmem:[#allocation10 + $0x10] sm:$0xff]  ;;  %v410_v4 = vld [vmem:[%s1663_s3] sm:$0xff]  ;;  %vm412_vm1 = vcmask 130048   ;;  %v562_v6 = vld [vmem:[#allocation10 + $0x8] sm:$0xff]  ;;  %vm565_vm2 = vcmask 261120   ;;  %s1327_s15 = smov 32  }
  0xa5   : > { %955 = vmatprep.mubr.msk.f32.mxu1 %vm1326_vm0, %v1325_v0  ;;  %973 = vmatprep.mubr.msk.f32.mxu0 %vm1326_vm0, %v1325_v0  ;;  %v408_v5 = vld [vmem:[%s345_s11] sm:$0xff]  ;;  %v561_v8 = vld [vmem:[#allocation10] sm:$0xff]  ;;  %s1328_s14 = smov 96   ;;  %s937_s13 = sshll.u32 %s1391_s28, 7 }
  0xa6   : > { %966 = vmatpush3.msra.mxu0 %v564_v1  ;;  %952 = vmatpush3.msra.mxu1 %v411_v2  ;;  %v487_v7 = vld [vmem:[#allocation8 + $0x8] sm:$0xff]  ;;  %v1608_v9 = vld [vmem:[%s336_s27] sm:$0xff]  ;;  %v486_v10 = vld [vmem:[#allocation8] sm:$0xff]  ;;  %s406_s18 = scalar_lea.vmem [#allocation13], %s1574_s16  ;;  %s763_s24 = scalar_lea.hbm %s1667_s7, %s937_s13 }
  0xa7   : > { %967 = vmatprep.subr.mxu0 %v1325_v0  ;;  %953 = vmatprep.subr.mxu1 %v1325_v0  ;;  %v932_v11 = vld [vmem:[#allocation11 + $0x2] ss:$0 sm:$0xff]  ;;  %v933_v13 = vld [vmem:[#allocation11 + $0x3] ss:$0 sm:$0xff]  ;;  %v692_v25 = vmul.f32 %v1608_v9, %v1608_v9  ;;  %v930_v27 = vld [vmem:[#allocation11] ss:$0 sm:$0xff] }
  0xa8   : > { %968 = vmatpush3.msra.mxu0 %v563_v3  ;;  %954 = vmatpush3.msra.mxu1 %v410_v4  ;;  %v409_v12 = vld [vmem:[%s354_s8] sm:$0xff]  ;;  %s765_s29 = sshll.u32 %s406_s18, 4  ;;  %s752_s19 = scalar_lea.sflag [#allocation4], %s1571_s4  ;;  %s766_s29 = int_to_ptr.vmem [resolvable:$true] %s765_s29 }
  0xa9   : > { %969 = vmatprep.subr.mxu0 %v1325_v0  ;;  %956 = vmatmul.mubr.msk.f32.vlgmr.msra.gmra.mxu1 %vm412_vm1, %v408_v5  ;;  %v693_v26 = vsel %vm565_vm2, %v692_v25, 0.0  ;;  %v931_v28 = vld [vmem:[#allocation11 + $0x1] ss:$0 sm:$0xff]  ;;  %s1239_s12 = scalar_lea.vmem %s766_s29, 128  ;;  %p1711_p7 = scmp.ne.s32.totalorder %s1695_s22, 0 }
  0xaa   : > { %970 = vmatpush3.msra.mxu0 %v562_v6  ;;  %958 = vmatprep.subr.mxu1 %v1325_v0  ;;  %p1240_p12 = scmp.ne.s32.totalorder %s766_s29, %s1239_s12  ;;  %s1329_s27 = smov [#allocation13]  }
  0xab   : > { %971 = vmatprep.subr.mxu0 %v1325_v0  ;;  %959 = vmatpush3.msra.mxu1 %v487_v7  ;;  %s1243_s9 = sshll.u32 %s1329_s27, 4  ;;  %s1244_s9 = int_to_ptr.vmem [resolvable:$false] %s1243_s9 }
  0xac   : > { %972 = vmatpush3.msra.mxu0 %v561_v8  ;;  %960 = vmatprep.subr.mxu1 %v1325_v0  ;;  %p1241_p0 = pnand %p1240_p12, %p1711_p7  ;;  %s1245_s28 = scalar_lea.vmem %s1244_s9, 256 }
  0xad   : > { %974 = vmatmul.mubr.msk.f32.vlgmr.msra.gmra.mxu0 %vm565_vm2, %v1608_v9  ;;  %961 = vmatpush3.msra.mxu1 %v486_v10  ;;  %p1246_p6 = scmp.lt.s32.totalorder %s766_s29, %s1244_s9  ;;  %p1247_p4 = scmp.lt.s32.totalorder %s1245_s28, %s1239_s12 }
  0xae   : > { %962 = vmatprep.mubr.msk.f32.mxu1 %vm1326_vm0, %v1325_v0  ;;  %668 = vrot.lane.b32.xlu0 %v932_v11, %s1327_s15  ;;  %p1242_p3 = pneg %p1241_p0 }
  0xaf   : > { %963 = vmatmul.mubr.msk.f32.vlgmr.msra.gmra.mxu1 %vm412_vm1, %v409_v12  ;;  %p1248_p8 = por %p1247_p4, %p1246_p6 }
  0xb1   : > { %p1249_p11 = pnand %p1248_p8, %p1242_p3 }
  0xb2   : > { %677 = vrot.lane.b32.xlu0 %v933_v13, %s1327_s15  ;;  %v935_v13 = vld [vmem:[#allocation11 + $0x5] ss:$0 sm:$0xff] }
 0x120   : > { %v669_v14 = vpop.permute.xlu0 %668 }
 0x124   : > { %v678_v18 = vpop.permute.xlu0 %677 }
 0x169   : > { %v482_v15 = vpop.f32.mrf.mxu1 }
 0x16a   : > { %v671_v22 = vadd.f32 %v669_v14, %v482_v15 }
 0x16b   : > { %v957_v16 = vpop.f32.mrf.mxu1 }
 0x16d   : > { %v635_v17 = vpop.f32.mrf.mxu0 }
 0x16e   : > { %v645_v19 = vadd.f32 %v635_v17, %v482_v15  ;;  %653 = vrot.lane.b32.xlu1 %v635_v17, %s1328_s14 }
 0x16f   : > { %v557_v20 = vpop.f32.mrf.mxu1  ;;  %v975_v21 = vpop.f32.mrf.mxu0 }
 0x170   : > { %v680_v23 = vadd.f32 %v678_v18, %v557_v20  ;;  %v650_v31 = vadd.f32 %v930_v27, %v645_v19 }
 0x171   : > { %v964_v24 = vpop.f32.mrf.mxu1 }
 0x172   : > { %682 = vrot.lane.b32.xlu1 %v671_v22, %s1328_s14  ;;  %687 = vrot.lane.b32.xlu0 %v680_v23, %s1328_s14  ;;  %v651_v35 = vmax.f32 %v650_v31, 0.0 }
 0x191   : > { %694 = vadd.xlane.f32.xlu0 %v693_v26 }
 0x1e0   : > { %v654_v29 = vpop.permute.xlu1 %653 }
 0x1e1   : > { %v656_v30 = vadd.f32 %v654_v29, %v557_v20 }
 0x1e3   : > { %v661_v32 = vadd.f32 %v931_v28, %v656_v30 }
 0x1e4   : > { %v683_v33 = vpop.permute.xlu1 %682  ;;  %v688_v34 = vpop.permute.xlu0 %687 }
 0x1e5   : > { %v662_v36 = vmax.f32 %v661_v32, 0.0  ;;  %v685_v37 = vmul.f32 %v683_v33, %v651_v35 }
 0x1e7   : > { %v690_v38 = vmul.f32 %v688_v34, %v662_v36 }
 0x1e9   : > { %v691_v39 = vadd.f32 %v690_v38, %v685_v37 }
 0x1eb   : > { %v703_v40 = vmul.f32 %v691_v39, %v691_v39 }
 0x1ed   : > { %v704_v41 = vsel %vm565_vm2, %v703_v40, 0.0 }
 0x1ee   : > { %705 = vadd.xlane.f32.xlu1 %v704_v41 }
 0x21a   : > { %v695_v46 = vpop.xlane.xlu0 %694 }
 0x21b   : > { %vm698_vm6 = vcmp.eq.f32.partialorder %v695_v46, inf  ;;  %v701_v55 = vand.u32 2147483648, %v695_v46  ;;  %vm700_vm7 = vcmp.eq.f32.partialorder %v695_v46, 0.0 }
 0x277   : > { %v706_v42 = vpop.xlane.xlu1 %705 }
 0x278   : > { %1069 = vrsqrt.f32 %v706_v42  ;;  %vm709_vm3 = vcmp.eq.f32.partialorder %v706_v42, inf  ;;  %v712_v45 = vand.u32 2147483648, %v706_v42  ;;  %vm711_vm4 = vcmp.eq.f32.partialorder %v706_v42, 0.0 }
 0x279   : > { %1071 = vrsqrt.f32 %v695_v46 }
 0x285   : > { %v1070_v43 = vpop.eup %1069 }
 0x286   : > { %v708_v44 = vmul.f32 %v1070_v43, %v706_v42  ;;  %v1072_v51 = vpop.eup %1071 }
 0x287   : > { %v697_v52 = vmul.f32 %v1072_v51, %v695_v46 }
 0x288   : > { %v710_v47 = vsel %vm709_vm3, %v706_v42, %v708_v44 }
 0x289   : > { %v713_v48 = vsel %vm711_vm4, %v712_v45, %v710_v47  ;;  %v699_v56 = vsel %vm698_vm6, %v695_v46, %v697_v52 }
 0x28a   : > { %vm714_vm5 = vcmp.eq.f32.partialorder %v713_v48, 0.0  ;;  %v702_v59 = vsel %vm700_vm7, %v701_v55, %v699_v56 }
 0x28b   : > { %v715_v49 = vsel %vm714_vm5, 1.0, %v713_v48 }
 0x28c   : > { %v716_v50 = vadd.f32 1e-06, %v715_v49 }
 0x28e   : > { %1073 = vrcp.f32 %v716_v50 }
 0x29b   : > { %v1074_v53 = vpop.eup %1073 }
 0x29c   : > { %v718_v54 = vmul.f32 %v1074_v53, %v716_v50 }
 0x29e   : > { %v719_v57 = vsub.f32 2.0, %v718_v54 }
 0x2a0   : > { %v720_v58 = vmul.f32 %v1074_v53, %v719_v57 }
 0x2a2   : > { %v721_v60 = vmul.f32 %v720_v58, %v702_v59 }
 0x2a4   : > { %v722_v61 = vmul.f32 0.5, %v721_v60 }
 0x2a6   : > { %v723_v62 = vmin.f32 %v722_v61, 1.0 }
 0x2a8   : > { %v724_v63 = vmul.f32 %v723_v62, %v691_v39 }
 0x2aa   : > { %v725_v0 = vadd.f32 %v724_v63, %v1608_v9  ;;  %v934_v9 = vld [vmem:[#allocation11 + $0x4] ss:$0 sm:$0xff] }
 0x2ac   : > { %v726_v1 = vsel %vm565_vm2, %v725_v0, 0.0 }
 0x2ad   : > { %727 = vadd.xlane.f32.xlu0 %v726_v1 }
 0x336   : > { %v728_v2 = vpop.xlane.xlu0 %727 }
 0x337   : > { %v730_v3 = vmul.f32 0.03125, %v728_v2 }
 0x339   : > { %v731_v4 = vsub.f32 %v725_v0, %v730_v3 }
 0x33b   : > { %v732_v5 = vmul.f32 %v731_v4, %v731_v4 }
 0x33d   : > { %v733_v6 = vsel %vm565_vm2, %v732_v5, 0.0 }
 0x33e   : > { %734 = vadd.xlane.f32.xlu1 %v733_v6 }
 0x3c7   : > { %v735_v7 = vpop.xlane.xlu1 %734 }
 0x3c8   : > { %v736_v8 = vmul.f32 0.03125, %v735_v7 }
 0x3ca   : > { %v737_v10 = vadd.f32 1e-05, %v736_v8 }
 0x3cc   : > { %1075 = vrsqrt.f32 %v737_v10 }
 0x3d9   : > { %v1076_v11 = vpop.eup %1075 }
 0x3da   : > { %v739_v12 = vmul.f32 %v1076_v11, %v731_v4 }
 0x3dc   : > { %v744_v14 = vmul.f32 %v934_v9, %v739_v12 }
 0x3de   : > { %v749_v15 = vadd.f32 %v935_v13, %v744_v14 }
 0x3e0   : > { %750 = vst.msk [vmem:[%s406_s18] sm:$0xff] %vm565_vm2, %v749_v15 }
 0x3e1   : > { %1252 = shalt.err (!%p1249_p11)
}
 0x3e2   : > { %s1253_s16 = scalar_lea.hbm %s763_s24, 128  ;;  %s1257_s11 = scalar_lea.hbm %s1667_s7, 256 }
 0x3e3   : > { %p1254_p5 = scmp.ne.s32.totalorder %s763_s24, %s1253_s16  ;;  %p1258_p2 = scmp.lt.s32.totalorder %s763_s24, %s1667_s7 }
 0x3e4   : > { %p1259_p13 = scmp.lt.s32.totalorder %s1257_s11, %s1253_s16 }
 0x3e5   : > { %p1255_p10 = pnand %p1254_p5, %p1711_p7 }
 0x3e6   : > { %p1260_p1 = por %p1259_p13, %p1258_p2 }
 0x3e7   : > { %p1256_p9 = pneg %p1255_p10 }
 0x3e9   : > { %p1261_p12 = pnand %p1260_p1, %p1256_p9 }
 0x3eb   : > { %1264 = shalt.err (!%p1261_p12)
}
 0x3ec   : > { %994 = dma.vmem_to_hbm [thread:$0]  (%p1711_p7), %s766_s29, 128, %s763_s24, %s752_s19  }
 0x3ed PF: > { %s1712_s1 = sld [smem:[#allocation19_spill]] }
 0x3ee   : > { %s1713_s17 = sld [smem:[#allocation21_spill]] }
 0x3ef   : > { %s1714_s20 = sld [smem:[#allocation20_spill]] }
 0x3f3   : > { %s777_s15 = sand.u32 1, %s1712_s1  }
 0x3f4   : > { %p1715_p0 = scmp.ne.s32.totalorder %s1713_s17, 0  ;;  %s778_s14 = scalar_lea.sflag [#allocation4], %s777_s15 }
 0x3f5   : > { %p1716_p3 = scmp.ge.s32.totalorder %s1714_s20, 2 }
 0x3f7   : > { %p1017_p6 = pnand %p1716_p3, %p1715_p0 }
 0x3f9   : > { %p1018_p4 = pneg %p1017_p6 }
 0x3fb   : > { %1298 = dma.done.wait (%p1018_p4), %s778_s14, 128  }
 0x3fc   : > { %1300 = vsyncadd (%p1018_p4), %s778_s14, 4294967168  ;;  %s1717_s27 = sld [smem:[#allocation22_spill]]  ;;  %s1719_s24 = smov %s1307_s25 }
 0x3fd   : > { %s1718_s13 = sld [smem:[#allocation23_spill]]  ;;  %s1720_s25 = smov %s1311_s26 }
 0x402   : > { %p25_p8 = scmp.ge.s32.totalorder %s1717_s27, 4  }
 0x403   : > { %s1721_s26 = smov %s1718_s13 }
 0x404   :  { %27 = sbr.rel (!%p25_p8) target bundleno = 12 (0xc), region = 129 }
 0x409   :  { %783 = vsyncpa [#allocation3], 1 }
 0x40a   :  { %785 = vsyncpa [#allocation3 + $0x1], 1 }
 0x40b   :  { %786 = vsyncpa [#allocation6], 1 }
 0x40c   :  { %788 = vsyncpa [#allocation6 + $0x1], 1 }
 0x40d   :  { %789 = vsyncpa [#allocation9], 1 }
 0x40e   :  { %790 = vsyncpa [#allocation12], 1 }
 0x40f   :  { %791 = vsyncpa [#allocation4], 1 }
 0x410   :  { %793 = vsyncpa [#allocation4 + $0x1], 1 }

</bundles_post_ra>
